<compile_context>
chip_gen: v7x
topology: tpu7x:2x2x1
jax: 0.10.0
libtpu: 0.0.40
codegen_flags: <defaults>
</compile_context>

<pallas_src>
import functools

import jax
import jax.numpy as jnp
from jax.experimental import pallas as pl
from jax.experimental.pallas import tpu as pltpu

LANE = 128


def _round_up(x, m):
    return ((x + m - 1) // m) * m


def _choose_tile(B, batch_tile, pack):
    """Pick a batch tile (multiple of `pack`) balancing padding waste against
    per-grid-step overhead (~0.35 us ~ a few hundred rows of work here)."""
    STEP_COST = 256  # per-grid-step overhead, in padded-row equivalents
    max_tile = max(pack, min(batch_tile, _round_up(B, pack)))
    best_key, best_tile, best_pad = None, max_tile, _round_up(B, max_tile)
    for t in range(pack, max_tile + 1, pack):
        b_pad = _round_up(B, t)
        grid = b_pad // t
        key = (b_pad + STEP_COST * grid, -t)   # min cost, tie -> larger tile
        if best_key is None or key < best_key:
            best_key, best_tile, best_pad = key, t, b_pad
    tile, b_pad = best_tile, best_pad
    # v7x: ensure >= 2 grid steps so the 'parallel' axis uses both TensorCores,
    # as long as it costs at most one extra pack of padded rows.
    if b_pad // tile == 1 and tile > pack:
        half = _round_up((tile + 1) // 2, pack)
        half_pad = _round_up(B, half)
        if half_pad - b_pad <= pack:
            tile, b_pad = half, half_pad
    return tile, b_pad


def mlp_kernel(x_ref,
               w1_ref, b1_ref,
               w2_ref, b2_ref,
               w3_ref, b3_ref,
               w4_ref, b4_ref,
               w5_ref, b5_ref,
               o_ref):
    def layer(h, w_ref, b_ref, relu):
        # MXU matmul with f32 accumulation; bias / activation math in f32.
        y = jnp.dot(h, w_ref[...], preferred_element_type=jnp.float32) + b_ref[...]
        if relu:
            # Fuse bias + ReLU + downcast into one VPU pass; the next matmul
            # consumes the compute dtype directly.
            return jnp.maximum(y, 0.0).astype(w_ref.dtype)
        return y  # final logits stay f32 for the sigmoid

    h = x_ref[...]
    h = layer(h, w1_ref, b1_ref, relu=True)
    h = layer(h, w2_ref, b2_ref, relu=True)
    h = layer(h, w3_ref, b3_ref, relu=True)
    h = layer(h, w4_ref, b4_ref, relu=True)   # lane-dense (tile, 128) after padding
    logits = layer(h, w5_ref, b5_ref, relu=False)   # lane-dense (tile, 128)
    o_ref[...] = jax.nn.sigmoid(logits).astype(o_ref.dtype)


@functools.partial(jax.jit, static_argnames=("batch_tile", "compute_dtype"))
def multilabel_nn_forward(x, params, *, batch_tile=512, compute_dtype=jnp.bfloat16):
    """x: (B, input_size). params: list of (W (in,out), b (1,out)) in float32.

    compute_dtype=bfloat16 (default) uses the bf16 MXU path with f32
    accumulation; pass jnp.float32 for exact f32 compute.
    """
    B, in_dim = x.shape
    out_dim = params[-1][0].shape[1]
    n_pad = _round_up(out_dim, LANE)

    # --- pad the layer-4 boundary (64 -> 128) and the final output (11 -> 128)
    #     so every activation / contraction / store is lane-dense. Exact:
    #     zero W4 cols + zero b4 -> ReLU(0)=0; zero W5 rows contribute nothing.
    (W1, b1), (W2, b2), (W3, b3), (W4, b4), (W5, b5) = params
    h4 = W4.shape[1]
    h4_pad = _round_up(h4, LANE)
    if h4_pad != h4:
        W4 = jnp.pad(W4, ((0, 0), (0, h4_pad - h4)))
        b4 = jnp.pad(b4, ((0, 0), (0, h4_pad - h4)))
        W5 = jnp.pad(W5, ((0, h4_pad - h4), (0, 0)))
    if n_pad != out_dim:
        W5 = jnp.pad(W5, ((0, 0), (0, n_pad - out_dim)))
        b5 = jnp.pad(b5, ((0, 0), (0, n_pad - out_dim)))
    padded_params = [(W1, b1), (W2, b2), (W3, b3), (W4, b4), (W5, b5)]

    # --- batch tiling: sublane pack 16 for sub-32-bit compute, 8 for f32.
    pack = 16 if jnp.dtype(compute_dtype).itemsize < 4 else 8
    tile, B_pad = _choose_tile(B, batch_tile, pack)
    x_p = x if B_pad == B else jnp.pad(x, ((0, B_pad - B), (0, 0)))
    x_p = x_p.astype(compute_dtype)

    # Weights/biases: full-array, single-copy VMEM residents (no per-step DMA,
    # no double-buffering). ~0.9 MiB bf16 / ~1.8 MiB f32 after padding.
    vmem_full = pl.BlockSpec(memory_space=pltpu.MemorySpace.VMEM)
    flat_args = []
    in_specs = [pl.BlockSpec((tile, in_dim), lambda i: (i, 0))]
    for (W, b) in padded_params:
        flat_args.extend([W.astype(compute_dtype), b.astype(jnp.float32)])
        in_specs.extend([vmem_full, vmem_full])

    grid = (B_pad // tile,)

    # TODO(synk): for repeated small-batch calls (decode-style loops), keep the
    # weights VMEM-resident across pallas_calls (cross-call prefetch / semaphore
    # futures) instead of re-staging ~1 MiB of weights every invocation.
    out = pl.pallas_call(
        mlp_kernel,
        out_shape=jax.ShapeDtypeStruct((B_pad, n_pad), jnp.float32),
        grid_spec=pltpu.PrefetchScalarGridSpec(
            num_scalar_prefetch=0,
            grid=grid,
            in_specs=in_specs,
            out_specs=pl.BlockSpec((tile, n_pad), lambda i: (i, 0)),
        ),
        compiler_params=pltpu.CompilerParams(
            dimension_semantics=("parallel",),   # shards batch tiles across TCs (v7x)
            vmem_limit_bytes=32 * 1024 * 1024,   # ample headroom on v5e/v6e/v7x
        ),
    )(x_p, *flat_args)

    return out[:B, :out_dim]


def init_linear(key, fan_in, fan_out):
    """PyTorch nn.Linear default init: U(-1/sqrt(fan_in), 1/sqrt(fan_in))."""
    kw, kb = jax.random.split(key)
    bound = 1.0 / jnp.sqrt(jnp.float32(fan_in))
    W = jax.random.uniform(kw, (fan_in, fan_out), jnp.float32, -bound, bound)
    b = jax.random.uniform(kb, (1, fan_out), jnp.float32, -bound, bound)
    return W, b


def make_params(key, input_size=512, output_size=11):
    dims = [input_size, 512, 256, 128, 64, output_size]
    keys = jax.random.split(key, len(dims) - 1)
    return [init_linear(k, dims[i], dims[i + 1]) for i, k in enumerate(keys)]


def reference_forward(x, params):
    h = x
    for (W, b) in params[:-1]:
        h = jnp.maximum(h @ W + b, 0.0)
    W, b = params[-1]
    return jax.nn.sigmoid(h @ W + b)


if __name__ == "__main__":
    key = jax.random.PRNGKey(0)
    k_params, k_x = jax.random.split(key)

    input_size, output_size = 512, 11
    batch = 20  # deliberately not a multiple of 8/16 to exercise batch padding
    params = make_params(k_params, input_size, output_size)
    x = jax.random.normal(k_x, (batch, input_size), jnp.float32)

    ref = jax.block_until_ready(reference_forward(x, params))

    # Default path: bf16 compute with f32 accumulation -> loose tolerance.
    out_bf16 = jax.block_until_ready(multilabel_nn_forward(x, params))
    assert out_bf16.shape == (batch, output_size), out_bf16.shape
    assert jnp.allclose(out_bf16, ref, atol=2e-2), "bf16 kernel mismatch vs reference"

    # Exact structural check with f32 compute.
    out_f32 = jax.block_until_ready(
        multilabel_nn_forward(x, params, compute_dtype=jnp.float32))
    assert out_f32.shape == (batch, output_size), out_f32.shape
    assert jnp.allclose(out_f32, ref, atol=1e-5, rtol=1e-5), "f32 kernel mismatch vs reference"

    print("KERNEL_OK")
</pallas_src>

<mosaic_0001>
module attributes {stable_mosaic.version = 11 : i64} {
  func.func @mlp_kernel(%arg0: i32, %arg1: memref<16x512xbf16, #tpu.memory_space<vmem>>, %arg2: memref<512x512xbf16, #tpu.memory_space<vmem>>, %arg3: memref<1x512xf32, #tpu.memory_space<vmem>>, %arg4: memref<512x256xbf16, #tpu.memory_space<vmem>>, %arg5: memref<1x256xf32, #tpu.memory_space<vmem>>, %arg6: memref<256x128xbf16, #tpu.memory_space<vmem>>, %arg7: memref<1x128xf32, #tpu.memory_space<vmem>>, %arg8: memref<128x128xbf16, #tpu.memory_space<vmem>>, %arg9: memref<1x128xf32, #tpu.memory_space<vmem>>, %arg10: memref<128x128xbf16, #tpu.memory_space<vmem>>, %arg11: memref<1x128xf32, #tpu.memory_space<vmem>>, %arg12: memref<16x128xf32, #tpu.memory_space<vmem>>) attributes {dimension_semantics = [#tpu.dimension_semantics<parallel>], iteration_bounds = array<i64: 2>, scalar_prefetch = 0 : i64, scratch_operands = 0 : i64, tpu.core_type = #tpu.core_type<tc>, window_params = [{transform_indices = @transform_0, window_bounds = array<i64: 16, 512>}, {pipeline_mode = #tpu.pipeline_mode<synchronous>, transform_indices = @transform_1, window_bounds = array<i64: 512, 512>}, {pipeline_mode = #tpu.pipeline_mode<synchronous>, transform_indices = @transform_2, window_bounds = array<i64: 1, 512>}, {pipeline_mode = #tpu.pipeline_mode<synchronous>, transform_indices = @transform_3, window_bounds = array<i64: 512, 256>}, {pipeline_mode = #tpu.pipeline_mode<synchronous>, transform_indices = @transform_4, window_bounds = array<i64: 1, 256>}, {pipeline_mode = #tpu.pipeline_mode<synchronous>, transform_indices = @transform_5, window_bounds = array<i64: 256, 128>}, {pipeline_mode = #tpu.pipeline_mode<synchronous>, transform_indices = @transform_6, window_bounds = array<i64: 1, 128>}, {pipeline_mode = #tpu.pipeline_mode<synchronous>, transform_indices = @transform_7, window_bounds = array<i64: 128, 128>}, {pipeline_mode = #tpu.pipeline_mode<synchronous>, transform_indices = @transform_8, window_bounds = array<i64: 1, 128>}, {pipeline_mode = #tpu.pipeline_mode<synchronous>, transform_indices = @transform_9, window_bounds = array<i64: 128, 128>}, {pipeline_mode = #tpu.pipeline_mode<synchronous>, transform_indices = @transform_10, window_bounds = array<i64: 1, 128>}, {transform_indices = @transform_11, window_bounds = array<i64: 16, 128>}]} {
    %c0 = arith.constant 0 : index
    %c0_0 = arith.constant 0 : index
    %0 = vector.load %arg1[%c0, %c0_0] : memref<16x512xbf16, #tpu.memory_space<vmem>>, vector<16x512xbf16>
    %c0_1 = arith.constant 0 : index
    %c0_2 = arith.constant 0 : index
    %1 = vector.load %arg2[%c0_1, %c0_2] : memref<512x512xbf16, #tpu.memory_space<vmem>>, vector<512x512xbf16>
    %cst = arith.constant dense<0.000000e+00> : vector<16x512xf32>
    %2 = tpu.matmul %0, %1, %cst {dimension_numbers = #tpu.dot_dimension_numbers<[1], [0], [0], [1], [0, 0, 1, 1], [], []>} : vector<16x512xbf16>, vector<512x512xbf16>, vector<16x512xf32> -> vector<16x512xf32>
    %c0_3 = arith.constant 0 : index
    %c0_4 = arith.constant 0 : index
    %3 = vector.load %arg3[%c0_3, %c0_4] : memref<1x512xf32, #tpu.memory_space<vmem>>, vector<1x512xf32>
    %4 = vector.broadcast %3 : vector<1x512xf32> to vector<16x512xf32>
    %5 = arith.addf %2, %4 : vector<16x512xf32>
    %cst_5 = arith.constant 0.000000e+00 : f32
    %6 = vector.broadcast %cst_5 : f32 to vector<16x512xf32>
    %7 = arith.maximumf %5, %6 : vector<16x512xf32>
    %8 = arith.truncf %7 : vector<16x512xf32> to vector<16x512xbf16>
    %c0_6 = arith.constant 0 : index
    %c0_7 = arith.constant 0 : index
    %9 = vector.load %arg4[%c0_6, %c0_7] : memref<512x256xbf16, #tpu.memory_space<vmem>>, vector<512x256xbf16>
    %cst_8 = arith.constant dense<0.000000e+00> : vector<16x256xf32>
    %10 = tpu.matmul %8, %9, %cst_8 {dimension_numbers = #tpu.dot_dimension_numbers<[1], [0], [0], [1], [0, 0, 1, 1], [], []>} : vector<16x512xbf16>, vector<512x256xbf16>, vector<16x256xf32> -> vector<16x256xf32>
    %c0_9 = arith.constant 0 : index
    %c0_10 = arith.constant 0 : index
    %11 = vector.load %arg5[%c0_9, %c0_10] : memref<1x256xf32, #tpu.memory_space<vmem>>, vector<1x256xf32>
    %12 = vector.broadcast %11 : vector<1x256xf32> to vector<16x256xf32>
    %13 = arith.addf %10, %12 : vector<16x256xf32>
    %cst_11 = arith.constant 0.000000e+00 : f32
    %14 = vector.broadcast %cst_11 : f32 to vector<16x256xf32>
    %15 = arith.maximumf %13, %14 : vector<16x256xf32>
    %16 = arith.truncf %15 : vector<16x256xf32> to vector<16x256xbf16>
    %c0_12 = arith.constant 0 : index
    %c0_13 = arith.constant 0 : index
    %17 = vector.load %arg6[%c0_12, %c0_13] : memref<256x128xbf16, #tpu.memory_space<vmem>>, vector<256x128xbf16>
    %cst_14 = arith.constant dense<0.000000e+00> : vector<16x128xf32>
    %18 = tpu.matmul %16, %17, %cst_14 {dimension_numbers = #tpu.dot_dimension_numbers<[1], [0], [0], [1], [0, 0, 1, 1], [], []>} : vector<16x256xbf16>, vector<256x128xbf16>, vector<16x128xf32> -> vector<16x128xf32>
    %c0_15 = arith.constant 0 : index
    %c0_16 = arith.constant 0 : index
    %19 = vector.load %arg7[%c0_15, %c0_16] : memref<1x128xf32, #tpu.memory_space<vmem>>, vector<1x128xf32>
    %20 = vector.broadcast %19 : vector<1x128xf32> to vector<16x128xf32>
    %21 = arith.addf %18, %20 : vector<16x128xf32>
    %cst_17 = arith.constant 0.000000e+00 : f32
    %22 = vector.broadcast %cst_17 : f32 to vector<16x128xf32>
    %23 = arith.maximumf %21, %22 : vector<16x128xf32>
    %24 = arith.truncf %23 : vector<16x128xf32> to vector<16x128xbf16>
    %c0_18 = arith.constant 0 : index
    %c0_19 = arith.constant 0 : index
    %25 = vector.load %arg8[%c0_18, %c0_19] : memref<128x128xbf16, #tpu.memory_space<vmem>>, vector<128x128xbf16>
    %cst_20 = arith.constant dense<0.000000e+00> : vector<16x128xf32>
    %26 = tpu.matmul %24, %25, %cst_20 {dimension_numbers = #tpu.dot_dimension_numbers<[1], [0], [0], [1], [0, 0, 1, 1], [], []>} : vector<16x128xbf16>, vector<128x128xbf16>, vector<16x128xf32> -> vector<16x128xf32>
    %c0_21 = arith.constant 0 : index
    %c0_22 = arith.constant 0 : index
    %27 = vector.load %arg9[%c0_21, %c0_22] : memref<1x128xf32, #tpu.memory_space<vmem>>, vector<1x128xf32>
    %28 = vector.broadcast %27 : vector<1x128xf32> to vector<16x128xf32>
    %29 = arith.addf %26, %28 : vector<16x128xf32>
    %cst_23 = arith.constant 0.000000e+00 : f32
    %30 = vector.broadcast %cst_23 : f32 to vector<16x128xf32>
    %31 = arith.maximumf %29, %30 : vector<16x128xf32>
    %32 = arith.truncf %31 : vector<16x128xf32> to vector<16x128xbf16>
    %c0_24 = arith.constant 0 : index
    %c0_25 = arith.constant 0 : index
    %33 = vector.load %arg10[%c0_24, %c0_25] : memref<128x128xbf16, #tpu.memory_space<vmem>>, vector<128x128xbf16>
    %cst_26 = arith.constant dense<0.000000e+00> : vector<16x128xf32>
    %34 = tpu.matmul %32, %33, %cst_26 {dimension_numbers = #tpu.dot_dimension_numbers<[1], [0], [0], [1], [0, 0, 1, 1], [], []>} : vector<16x128xbf16>, vector<128x128xbf16>, vector<16x128xf32> -> vector<16x128xf32>
    %c0_27 = arith.constant 0 : index
    %c0_28 = arith.constant 0 : index
    %35 = vector.load %arg11[%c0_27, %c0_28] : memref<1x128xf32, #tpu.memory_space<vmem>>, vector<1x128xf32>
    %36 = vector.broadcast %35 : vector<1x128xf32> to vector<16x128xf32>
    %37 = arith.addf %34, %36 : vector<16x128xf32>
    %38 = arith.negf %37 : vector<16x128xf32>
    %39 = math.exp %38 : vector<16x128xf32>
    %cst_29 = arith.constant 1.000000e+00 : f32
    %40 = vector.broadcast %cst_29 : f32 to vector<16x128xf32>
    %41 = arith.addf %40, %39 : vector<16x128xf32>
    %42 = arith.divf %40, %41 : vector<16x128xf32>
    %c0_30 = arith.constant 0 : index
    %c0_31 = arith.constant 0 : index
    %43 = vector.load %arg12[%c0_30, %c0_31] : memref<16x128xf32, #tpu.memory_space<vmem>>, vector<16x128xf32>
    tpu.vector_store %arg12[%c0_30, %c0_31], %42 {strides = array<i32>} : memref<16x128xf32, #tpu.memory_space<vmem>>, vector<16x128xf32>,
    return
  }
  func.func @transform_0(%arg0: i32) -> (i32, i32) {
    %c0_i32 = arith.constant 0 : i32
    %c0_i32_0 = arith.constant 0 : i32
    return %arg0, %c0_i32 : i32, i32
  }
  func.func @transform_1(%arg0: i32) -> (i32, i32) {
    %c0_i32 = arith.constant 0 : i32
    %c0_i32_0 = arith.constant 0 : i32
    %c0_i32_1 = arith.constant 0 : i32
    return %c0_i32, %c0_i32_0 : i32, i32
  }
  func.func @transform_2(%arg0: i32) -> (i32, i32) {
    %c0_i32 = arith.constant 0 : i32
    %c0_i32_0 = arith.constant 0 : i32
    %c0_i32_1 = arith.constant 0 : i32
    return %c0_i32, %c0_i32_0 : i32, i32
  }
  func.func @transform_3(%arg0: i32) -> (i32, i32) {
    %c0_i32 = arith.constant 0 : i32
    %c0_i32_0 = arith.constant 0 : i32
    %c0_i32_1 = arith.constant 0 : i32
    return %c0_i32, %c0_i32_0 : i32, i32
  }
  func.func @transform_4(%arg0: i32) -> (i32, i32) {
    %c0_i32 = arith.constant 0 : i32
    %c0_i32_0 = arith.constant 0 : i32
    %c0_i32_1 = arith.constant 0 : i32
    return %c0_i32, %c0_i32_0 : i32, i32
  }
  func.func @transform_5(%arg0: i32) -> (i32, i32) {
    %c0_i32 = arith.constant 0 : i32
    %c0_i32_0 = arith.constant 0 : i32
    %c0_i32_1 = arith.constant 0 : i32
    return %c0_i32, %c0_i32_0 : i32, i32
  }
  func.func @transform_6(%arg0: i32) -> (i32, i32) {
    %c0_i32 = arith.constant 0 : i32
    %c0_i32_0 = arith.constant 0 : i32
    %c0_i32_1 = arith.constant 0 : i32
    return %c0_i32, %c0_i32_0 : i32, i32
  }
  func.func @transform_7(%arg0: i32) -> (i32, i32) {
    %c0_i32 = arith.constant 0 : i32
    %c0_i32_0 = arith.constant 0 : i32
    %c0_i32_1 = arith.constant 0 : i32
    return %c0_i32, %c0_i32_0 : i32, i32
  }
  func.func @transform_8(%arg0: i32) -> (i32, i32) {
    %c0_i32 = arith.constant 0 : i32
    %c0_i32_0 = arith.constant 0 : i32
    %c0_i32_1 = arith.constant 0 : i32
    return %c0_i32, %c0_i32_0 : i32, i32
  }
  func.func @transform_9(%arg0: i32) -> (i32, i32) {
    %c0_i32 = arith.constant 0 : i32
    %c0_i32_0 = arith.constant 0 : i32
    %c0_i32_1 = arith.constant 0 : i32
    return %c0_i32, %c0_i32_0 : i32, i32
  }
  func.func @transform_10(%arg0: i32) -> (i32, i32) {
    %c0_i32 = arith.constant 0 : i32
    %c0_i32_0 = arith.constant 0 : i32
    %c0_i32_1 = arith.constant 0 : i32
    return %c0_i32, %c0_i32_0 : i32, i32
  }
  func.func @transform_11(%arg0: i32) -> (i32, i32) {
    %c0_i32 = arith.constant 0 : i32
    %c0_i32_0 = arith.constant 0 : i32
    return %arg0, %c0_i32 : i32, i32
  }
}

</mosaic_0001>

<bundles_post_ra>
// kernel: multilabel_nn_forward.1
= control target key start
LH: loop header
LB: loop body
LE: loop exit
PB: predicated region body
PF: predicated region fallthrough
CT: control target
= control target key end

     0   :  { %s3120_s17 = smov 0   ;;  %s3873_s0 = inlined_call_operand.vmem [shape: bf16[32,512], index: 0, kind: input, shape index: {}]   ;;  %s3874_s1 = inlined_call_operand.vmem [shape: bf16[512,512], index: 1, kind: input, shape index: {}]   ;;  %s3875_s2 = inlined_call_operand.vmem [shape: f32[1,512], index: 2, kind: input, shape index: {}]   ;;  %s3876_s3 = inlined_call_operand.vmem [shape: bf16[512,256], index: 3, kind: input, shape index: {}]   ;;  %s3877_s4 = inlined_call_operand.vmem [shape: f32[1,256], index: 4, kind: input, shape index: {}]   ;;  %s3878_s5 = inlined_call_operand.vmem [shape: bf16[256,128], index: 5, kind: input, shape index: {}]   ;;  %s3879_s6 = inlined_call_operand.vmem [shape: f32[1,128], index: 6, kind: input, shape index: {}]   ;;  %s3880_s7 = inlined_call_operand.vmem [shape: bf16[128,128], index: 7, kind: input, shape index: {}]   ;;  %s3881_s8 = inlined_call_operand.vmem [shape: f32[1,128], index: 8, kind: input, shape index: {}]   ;;  %s3882_s9 = inlined_call_operand.vmem [shape: bf16[128,128], index: 9, kind: input, shape index: {}]   ;;  %s3883_s10 = inlined_call_operand.vmem [shape: f32[1,128], index: 10, kind: input, shape index: {}]   ;;  %s3884_s11 = inlined_call_operand.vmem [shape: f32[32,128], index: 11, kind: output, shape index: {}]  }
   0x1 LB: > { %s2356_s18 = sadd.s32 4294967295, %s3056_s17   ;;  %p2360_p0 = scmp.ge.s32.totalorder %s3056_s17, 1  ;;  %s3056_s17 = sphi %s3120_s17, %s21_s17  }
   0x2   : > { %p339_p1 = scmp.lt.s32.totalorder %s3056_s17, 3 }
   0x4   : > { %p340_p2 = pnand %p2360_p0, %p339_p1 }
   0x5   : > { %v2716_v0 = vld [vmem:[%s3874_s1 + $0x4] ss:$16 sps:$4 sm:$0xff] (!%p340_p2)   ;;  %v2718_v1 = vld [vmem:[%s3874_s1 + $0xc] ss:$16 sps:$4 sm:$0xff] (!%p340_p2)   ;;  %v2720_v2 = vld [vmem:[%s3874_s1] ss:$16 sps:$4 sm:$0xff] (!%p340_p2)  }
   0x6   : > { %343 = sbr.rel (%p340_p2) target bundleno = 1328 (0x530), region = 64  ;;  %1208 = vmatprep.subr.bf16.mxu0 (!%p340_p2), %v2716_v0  ;;  %v2721_v3 = vld [vmem:[%s3874_s1 + $0x8] ss:$16 sps:$4 sm:$0xff] (!%p340_p2)   ;;  %1294 = vmatprep.subr.bf16.mxu1 (!%p340_p2), %v2718_v1  ;;  %v2722_v4 = vld [vmem:[%s3874_s1 + $0x24] ss:$16 sps:$4 sm:$0xff] (!%p340_p2)   ;;  %s2361_s28 = sshll.u32 (!%p340_p2), %s2356_s18, 1 }
   0x7   : > { %1209 = vmatpush1.bf16.msra.mxu0 (!%p340_p2), %v2720_v2  ;;  %1295 = vmatpush1.bf16.msra.mxu1 (!%p340_p2), %v2721_v3  ;;  %v2724_v5 = vld [vmem:[%s3874_s1 + $0x2c] ss:$16 sps:$4 sm:$0xff] (!%p340_p2)   ;;  %v2726_v6 = vld [vmem:[%s3874_s1 + $0x20] ss:$16 sps:$4 sm:$0xff] (!%p340_p2)   ;;  %v2727_v7 = vld [vmem:[%s3874_s1 + $0x28] ss:$16 sps:$4 sm:$0xff] (!%p340_p2)  }
   0x8   : > { %1210 = vmatprep.subr.bf16.mxu0 (!%p340_p2), %v2722_v4  ;;  %1296 = vmatprep.subr.bf16.mxu1 (!%p340_p2), %v2724_v5  ;;  %v2728_v8 = vld [vmem:[%s3874_s1 + $0x44] ss:$16 sps:$4 sm:$0xff] (!%p340_p2)   ;;  %v2730_v9 = vld [vmem:[%s3874_s1 + $0x4c] ss:$16 sps:$4 sm:$0xff] (!%p340_p2)   ;;  %v2732_v10 = vld [vmem:[%s3874_s1 + $0x40] ss:$16 sps:$4 sm:$0xff] (!%p340_p2)  }
   0x9   : > { %v2733_v11 = vld [vmem:[%s3874_s1 + $0x48] ss:$16 sps:$4 sm:$0xff] (!%p340_p2)   ;;  %v2734_v12 = vld [vmem:[%s3874_s1 + $0x64] ss:$16 sps:$4 sm:$0xff] (!%p340_p2)   ;;  %v2736_v13 = vld [vmem:[%s3874_s1 + $0x6c] ss:$16 sps:$4 sm:$0xff] (!%p340_p2)  }
   0xa   : > { %v2738_v14 = vld [vmem:[%s3874_s1 + $0x60] ss:$16 sps:$4 sm:$0xff] (!%p340_p2)   ;;  %v2739_v15 = vld [vmem:[%s3874_s1 + $0x68] ss:$16 sps:$4 sm:$0xff] (!%p340_p2)   ;;  %v2740_v16 = vld [vmem:[%s3874_s1 + $0x84] ss:$16 sps:$4 sm:$0xff] (!%p340_p2)  }
   0xb   : > { %1211 = vmatpush1.bf16.msra.mxu0 (!%p340_p2), %v2726_v6  ;;  %1297 = vmatpush1.bf16.msra.mxu1 (!%p340_p2), %v2727_v7  ;;  %v2742_v17 = vld [vmem:[%s3874_s1 + $0x8c] ss:$16 sps:$4 sm:$0xff] (!%p340_p2)   ;;  %v2744_v18 = vld [vmem:[%s3874_s1 + $0x80] ss:$16 sps:$4 sm:$0xff] (!%p340_p2)   ;;  %v2745_v19 = vld [vmem:[%s3874_s1 + $0x88] ss:$16 sps:$4 sm:$0xff] (!%p340_p2)  }
   0xc   : > { %1212 = vmatprep.subr.bf16.mxu0 (!%p340_p2), %v2728_v8  ;;  %1298 = vmatprep.subr.bf16.mxu1 (!%p340_p2), %v2730_v9  ;;  %v2746_v20 = vld [vmem:[%s3874_s1 + $0xa4] ss:$16 sps:$4 sm:$0xff] (!%p340_p2)   ;;  %v2748_v21 = vld [vmem:[%s3874_s1 + $0xac] ss:$16 sps:$4 sm:$0xff] (!%p340_p2)   ;;  %v2750_v22 = vld [vmem:[%s3874_s1 + $0xa0] ss:$16 sps:$4 sm:$0xff] (!%p340_p2)  }
   0xd   : > { %v2751_v23 = vld [vmem:[%s3874_s1 + $0xa8] ss:$16 sps:$4 sm:$0xff]   ;;  %v2752_v24 = vld [vmem:[%s3874_s1 + $0xc4] ss:$16 sps:$4 sm:$0xff]   ;;  %v2754_v25 = vld [vmem:[%s3874_s1 + $0xcc] ss:$16 sps:$4 sm:$0xff]  }
   0xe   : > { %v2756_v26 = vld [vmem:[%s3874_s1 + $0xc0] ss:$16 sps:$4 sm:$0xff]   ;;  %v2757_v27 = vld [vmem:[%s3874_s1 + $0xc8] ss:$16 sps:$4 sm:$0xff]   ;;  %v2758_v28 = vld [vmem:[%s3874_s1 + $0xe4] ss:$16 sps:$4 sm:$0xff]  }
   0xf   : > { %1213 = vmatpush1.bf16.msra.mxu0 %v2732_v10  ;;  %1299 = vmatpush1.bf16.msra.mxu1 %v2733_v11  ;;  %v2760_v29 = vld [vmem:[%s3874_s1 + $0xec] ss:$16 sps:$4 sm:$0xff]   ;;  %v2762_v30 = vld [vmem:[%s3874_s1 + $0xe0] ss:$16 sps:$4 sm:$0xff]   ;;  %v2763_v31 = vld [vmem:[%s3874_s1 + $0xe8] ss:$16 sps:$4 sm:$0xff]  }
  0x10   : > { %1214 = vmatprep.subr.bf16.mxu0 %v2734_v12  ;;  %1300 = vmatprep.subr.bf16.mxu1 %v2736_v13  ;;  %v2764_v32 = vld [vmem:[%s3874_s1 + $0x104] ss:$16 sps:$4 sm:$0xff]   ;;  %v2766_v33 = vld [vmem:[%s3874_s1 + $0x10c] ss:$16 sps:$4 sm:$0xff]   ;;  %p381_p3 = scmp.lt.s32.totalorder %s2361_s28, 3  ;;  %vm3059_vm0 = vmmov 0  }
  0x11   : > { %v2768_v34 = vld [vmem:[%s3874_s1 + $0x100] ss:$16 sps:$4 sm:$0xff]   ;;  %v2769_v35 = vld [vmem:[%s3874_s1 + $0x108] ss:$16 sps:$4 sm:$0xff]   ;;  %v2770_v36 = vld [vmem:[%s3874_s1 + $0x124] ss:$16 sps:$4 sm:$0xff]  }
  0x12   : > { %v2772_v37 = vld [vmem:[%s3874_s1 + $0x12c] ss:$16 sps:$4 sm:$0xff]   ;;  %s3886_s28 = smov (!%p381_p3, %s2361_s28), 3  ;;  %v2774_v38 = vld [vmem:[%s3874_s1 + $0x120] ss:$16 sps:$4 sm:$0xff]  }
  0x13   : > { %1215 = vmatpush1.bf16.msra.mxu0 %v2738_v14  ;;  %1301 = vmatpush1.bf16.msra.mxu1 %v2739_v15  ;;  %v2775_v39 = vld [vmem:[%s3874_s1 + $0x128] ss:$16 sps:$4 sm:$0xff]   ;;  %v2776_v40 = vld [vmem:[%s3874_s1 + $0x144] ss:$16 sps:$4 sm:$0xff]   ;;  %v2778_v41 = vld [vmem:[%s3874_s1 + $0x14c] ss:$16 sps:$4 sm:$0xff]  }
  0x14   : > { %1216 = vmatprep.subr.bf16.mxu0 %v2740_v16  ;;  %1302 = vmatprep.subr.bf16.mxu1 %v2742_v17  ;;  %s2601_s19 = sshll.u32 %s3886_s28, 4  ;;  %v2780_v42 = vld [vmem:[%s3874_s1 + $0x140] ss:$16 sps:$4 sm:$0xff]   ;;  %v2781_v43 = vld [vmem:[%s3874_s1 + $0x148] ss:$16 sps:$4 sm:$0xff]   ;;  %s2365_s14 = sshll.u32 %s3886_s28, 3 }
  0x15   : > { %v2782_v44 = vld [vmem:[%s3874_s1 + $0x164] ss:$16 sps:$4 sm:$0xff]   ;;  %s3271_s27 = scalar_lea.vmem %s3873_s0, %s2601_s19  ;;  %v2784_v45 = vld [vmem:[%s3874_s1 + $0x16c] ss:$16 sps:$4 sm:$0xff]   ;;  %v2786_v46 = vld [vmem:[%s3874_s1 + $0x160] ss:$16 sps:$4 sm:$0xff]   ;;  %s391_s19 = scalar_lea.vmem %s3884_s11, %s2365_s14 }
  0x16   : > { %v2787_v47 = vld [vmem:[%s3874_s1 + $0x168] ss:$16 sps:$4 sm:$0xff]   ;;  %v2814_v48 = vld [vmem:[%s3271_s27 + $0x4] ss:$16 sps:$4 sm:$0xff]   ;;  %v2790_v50 = vld [vmem:[%s3874_s1 + $0x18c] ss:$16 sps:$4 sm:$0xff]  }
  0x17   : > { %1217 = vmatpush1.bf16.msra.mxu0 %v2744_v18  ;;  %1303 = vmatpush1.bf16.msra.mxu1 %v2745_v19  ;;  %v2788_v49 = vld [vmem:[%s3874_s1 + $0x184] ss:$16 sps:$4 sm:$0xff]   ;;  %v2792_v51 = vld [vmem:[%s3874_s1 + $0x180] ss:$16 sps:$4 sm:$0xff]   ;;  %v2793_v52 = vld [vmem:[%s3874_s1 + $0x188] ss:$16 sps:$4 sm:$0xff]  }
  0x18   : > { %1218 = vmatprep.subr.bf16.mxu0 %v2746_v20  ;;  %1304 = vmatprep.subr.bf16.mxu1 %v2748_v21  ;;  %v2794_v53 = vld [vmem:[%s3874_s1 + $0x1a4] ss:$16 sps:$4 sm:$0xff]   ;;  %v2796_v54 = vld [vmem:[%s3874_s1 + $0x1ac] ss:$16 sps:$4 sm:$0xff]   ;;  %v2798_v55 = vld [vmem:[%s3874_s1 + $0x1a0] ss:$16 sps:$4 sm:$0xff]  }
  0x19   : > { %1240 = vmatprep.mubr.bf16.mxu0 %v2814_v48  ;;  %1326 = vmatprep.mubr.bf16.mxu1 %v2814_v48  ;;  %v2799_v56 = vld [vmem:[%s3874_s1 + $0x1a8] ss:$16 sps:$4 sm:$0xff]   ;;  %v2800_v57 = vld [vmem:[%s3874_s1 + $0x1c4] ss:$16 sps:$4 sm:$0xff]   ;;  %v2802_v58 = vld [vmem:[%s3874_s1 + $0x1cc] ss:$16 sps:$4 sm:$0xff]  }
  0x1a   : > { %v2804_v59 = vld [vmem:[%s3874_s1 + $0x1c0] ss:$16 sps:$4 sm:$0xff]   ;;  %v2805_v60 = vld [vmem:[%s3874_s1 + $0x1c8] ss:$16 sps:$4 sm:$0xff]   ;;  %v2806_v61 = vld [vmem:[%s3874_s1 + $0x1e4] ss:$16 sps:$4 sm:$0xff]  }
  0x1b   : > { %1219 = vmatpush1.bf16.msra.mxu0 %v2750_v22  ;;  %1305 = vmatpush1.bf16.msra.mxu1 %v2751_v23  ;;  %v2808_v62 = vld [vmem:[%s3874_s1 + $0x1ec] ss:$16 sps:$4 sm:$0xff]   ;;  %v2810_v63 = vld [vmem:[%s3874_s1 + $0x1e0] ss:$16 sps:$4 sm:$0xff]   ;;  %v2811_v0 = vld [vmem:[%s3874_s1 + $0x1e8] ss:$16 sps:$4 sm:$0xff]  }
  0x1c   : > { %1220 = vmatprep.subr.bf16.mxu0 %v2752_v24  ;;  %1306 = vmatprep.subr.bf16.mxu1 %v2754_v25  ;;  %v2817_v1 = vld [vmem:[%s3874_s1 + $0x204] ss:$16 sps:$4 sm:$0xff]   ;;  %v2820_v2 = vld [vmem:[%s3874_s1 + $0x20c] ss:$16 sps:$4 sm:$0xff]   ;;  %v2812_v3 = vld [vmem:[%s3271_s27] ss:$16 sps:$4 sm:$0xff]  }
  0x1d   : > { %v2815_v4 = vld [vmem:[%s3874_s1 + $0x200] ss:$16 sps:$4 sm:$0xff]   ;;  %v2818_v5 = vld [vmem:[%s3874_s1 + $0x208] ss:$16 sps:$4 sm:$0xff]   ;;  %v2823_v6 = vld [vmem:[%s3874_s1 + $0x224] ss:$16 sps:$4 sm:$0xff]  }
  0x1e   : > { %v2826_v7 = vld [vmem:[%s3874_s1 + $0x22c] ss:$16 sps:$4 sm:$0xff]   ;;  %v2821_v8 = vld [vmem:[%s3874_s1 + $0x220] ss:$16 sps:$4 sm:$0xff]   ;;  %v2824_v9 = vld [vmem:[%s3874_s1 + $0x228] ss:$16 sps:$4 sm:$0xff]  }
  0x1f   : > { %1221 = vmatpush1.bf16.msra.mxu0 %v2756_v26  ;;  %1307 = vmatpush1.bf16.msra.mxu1 %v2757_v27  ;;  %v2829_v10 = vld [vmem:[%s3874_s1 + $0x244] ss:$16 sps:$4 sm:$0xff]   ;;  %v2832_v11 = vld [vmem:[%s3874_s1 + $0x24c] ss:$16 sps:$4 sm:$0xff]   ;;  %v2827_v12 = vld [vmem:[%s3874_s1 + $0x240] ss:$16 sps:$4 sm:$0xff]  }
  0x20   : > { %1222 = vmatprep.subr.bf16.mxu0 %v2758_v28  ;;  %1308 = vmatprep.subr.bf16.mxu1 %v2760_v29  ;;  %v2830_v13 = vld [vmem:[%s3874_s1 + $0x248] ss:$16 sps:$4 sm:$0xff]   ;;  %v2835_v14 = vld [vmem:[%s3874_s1 + $0x264] ss:$16 sps:$4 sm:$0xff]   ;;  %v2838_v15 = vld [vmem:[%s3874_s1 + $0x26c] ss:$16 sps:$4 sm:$0xff]  }
  0x21   : > { %v2833_v16 = vld [vmem:[%s3874_s1 + $0x260] ss:$16 sps:$4 sm:$0xff]   ;;  %v2836_v17 = vld [vmem:[%s3874_s1 + $0x268] ss:$16 sps:$4 sm:$0xff]   ;;  %v2841_v18 = vld [vmem:[%s3874_s1 + $0x284] ss:$16 sps:$4 sm:$0xff]  }
  0x22   : > { %v2844_v19 = vld [vmem:[%s3874_s1 + $0x28c] ss:$16 sps:$4 sm:$0xff]   ;;  %v2839_v20 = vld [vmem:[%s3874_s1 + $0x280] ss:$16 sps:$4 sm:$0xff]   ;;  %v2842_v21 = vld [vmem:[%s3874_s1 + $0x288] ss:$16 sps:$4 sm:$0xff]  }
  0x23   : > { %1223 = vmatpush1.bf16.msra.mxu0 %v2762_v30  ;;  %1309 = vmatpush1.bf16.msra.mxu1 %v2763_v31  ;;  %v2847_v22 = vld [vmem:[%s3874_s1 + $0x2a4] ss:$16 sps:$4 sm:$0xff]   ;;  %v2850_v23 = vld [vmem:[%s3874_s1 + $0x2ac] ss:$16 sps:$4 sm:$0xff]   ;;  %v2845_v24 = vld [vmem:[%s3874_s1 + $0x2a0] ss:$16 sps:$4 sm:$0xff]  }
  0x24   : > { %1224 = vmatprep.subr.bf16.mxu0 %v2764_v32  ;;  %1310 = vmatprep.subr.bf16.mxu1 %v2766_v33  ;;  %v2848_v25 = vld [vmem:[%s3874_s1 + $0x2a8] ss:$16 sps:$4 sm:$0xff]   ;;  %v2853_v26 = vld [vmem:[%s3874_s1 + $0x2c4] ss:$16 sps:$4 sm:$0xff]   ;;  %v2856_v27 = vld [vmem:[%s3874_s1 + $0x2cc] ss:$16 sps:$4 sm:$0xff]  }
  0x25   : > { %v2851_v28 = vld [vmem:[%s3874_s1 + $0x2c0] ss:$16 sps:$4 sm:$0xff]   ;;  %v2854_v29 = vld [vmem:[%s3874_s1 + $0x2c8] ss:$16 sps:$4 sm:$0xff]   ;;  %v2913_v30 = vld [vmem:[%s3271_s27 + $0xc] ss:$16 sps:$4 sm:$0xff]  }
  0x26   : > { %v2859_v31 = vld [vmem:[%s3874_s1 + $0x2e4] ss:$16 sps:$4 sm:$0xff]   ;;  %v2862_v32 = vld [vmem:[%s3874_s1 + $0x2ec] ss:$16 sps:$4 sm:$0xff]   ;;  %v2857_v33 = vld [vmem:[%s3874_s1 + $0x2e0] ss:$16 sps:$4 sm:$0xff]  }
  0x27   : > { %1225 = vmatpush1.bf16.msra.mxu0 %v2768_v34  ;;  %1311 = vmatpush1.bf16.msra.mxu1 %v2769_v35  ;;  %v2860_v34 = vld [vmem:[%s3874_s1 + $0x2e8] ss:$16 sps:$4 sm:$0xff]   ;;  %v2865_v35 = vld [vmem:[%s3874_s1 + $0x304] ss:$16 sps:$4 sm:$0xff]   ;;  %v2886_v48 = vld [vmem:[%s3874_s1 + $0x36c] ss:$16 sps:$4 sm:$0xff]  }
  0x28   : > { %1226 = vmatprep.subr.bf16.mxu0 %v2770_v36  ;;  %1312 = vmatprep.subr.bf16.mxu1 %v2772_v37  ;;  %v2868_v36 = vld [vmem:[%s3874_s1 + $0x30c] ss:$16 sps:$4 sm:$0xff]   ;;  %v2863_v37 = vld [vmem:[%s3874_s1 + $0x300] ss:$16 sps:$4 sm:$0xff]  }
  0x2b   : > { %1227 = vmatpush1.bf16.msra.mxu0 %v2774_v38  ;;  %1313 = vmatpush1.bf16.msra.mxu1 %v2775_v39  ;;  %v2866_v38 = vld [vmem:[%s3874_s1 + $0x308] ss:$16 sps:$4 sm:$0xff]   ;;  %v2871_v39 = vld [vmem:[%s3874_s1 + $0x324] ss:$16 sps:$4 sm:$0xff]  }
  0x2c   : > { %1228 = vmatprep.subr.bf16.mxu0 %v2776_v40  ;;  %1314 = vmatprep.subr.bf16.mxu1 %v2778_v41  ;;  %v2874_v40 = vld [vmem:[%s3874_s1 + $0x32c] ss:$16 sps:$4 sm:$0xff]   ;;  %v2869_v41 = vld [vmem:[%s3874_s1 + $0x320] ss:$16 sps:$4 sm:$0xff]  }
  0x2f   : > { %1229 = vmatpush1.bf16.msra.mxu0 %v2780_v42  ;;  %1315 = vmatpush1.bf16.msra.mxu1 %v2781_v43  ;;  %v2872_v42 = vld [vmem:[%s3874_s1 + $0x328] ss:$16 sps:$4 sm:$0xff]   ;;  %v2877_v43 = vld [vmem:[%s3874_s1 + $0x344] ss:$16 sps:$4 sm:$0xff]  }
  0x30   : > { %1230 = vmatprep.subr.bf16.mxu0 %v2782_v44  ;;  %1316 = vmatprep.subr.bf16.mxu1 %v2784_v45  ;;  %v2880_v44 = vld [vmem:[%s3874_s1 + $0x34c] ss:$16 sps:$4 sm:$0xff]   ;;  %v2875_v45 = vld [vmem:[%s3874_s1 + $0x340] ss:$16 sps:$4 sm:$0xff]  }
  0x33   : > { %1231 = vmatpush1.bf16.msra.mxu0 %v2786_v46  ;;  %1317 = vmatpush1.bf16.msra.mxu1 %v2787_v47  ;;  %v2878_v46 = vld [vmem:[%s3874_s1 + $0x348] ss:$16 sps:$4 sm:$0xff]   ;;  %v2883_v47 = vld [vmem:[%s3874_s1 + $0x364] ss:$16 sps:$4 sm:$0xff]  }
  0x34   : > { %1232 = vmatprep.subr.bf16.mxu0 %v2788_v49  ;;  %1318 = vmatprep.subr.bf16.mxu1 %v2790_v50  ;;  %v2881_v49 = vld [vmem:[%s3874_s1 + $0x360] ss:$16 sps:$4 sm:$0xff]   ;;  %v2884_v50 = vld [vmem:[%s3874_s1 + $0x368] ss:$16 sps:$4 sm:$0xff]  }
  0x37   : > { %1233 = vmatpush1.bf16.msra.mxu0 %v2792_v51  ;;  %1319 = vmatpush1.bf16.msra.mxu1 %v2793_v52  ;;  %v2889_v51 = vld [vmem:[%s3874_s1 + $0x384] ss:$16 sps:$4 sm:$0xff]   ;;  %v2892_v52 = vld [vmem:[%s3874_s1 + $0x38c] ss:$16 sps:$4 sm:$0xff]  }
  0x38   : > { %1234 = vmatprep.subr.bf16.mxu0 %v2794_v53  ;;  %1320 = vmatprep.subr.bf16.mxu1 %v2796_v54  ;;  %v2887_v53 = vld [vmem:[%s3874_s1 + $0x380] ss:$16 sps:$4 sm:$0xff]   ;;  %v2890_v54 = vld [vmem:[%s3874_s1 + $0x388] ss:$16 sps:$4 sm:$0xff]  }
  0x3b   : > { %1235 = vmatpush1.bf16.msra.mxu0 %v2798_v55  ;;  %1321 = vmatpush1.bf16.msra.mxu1 %v2799_v56  ;;  %v2895_v55 = vld [vmem:[%s3874_s1 + $0x3a4] ss:$16 sps:$4 sm:$0xff]   ;;  %v2898_v56 = vld [vmem:[%s3874_s1 + $0x3ac] ss:$16 sps:$4 sm:$0xff]  }
  0x3c   : > { %1236 = vmatprep.subr.bf16.mxu0 %v2800_v57  ;;  %1322 = vmatprep.subr.bf16.mxu1 %v2802_v58  ;;  %v2893_v57 = vld [vmem:[%s3874_s1 + $0x3a0] ss:$16 sps:$4 sm:$0xff]   ;;  %v2896_v58 = vld [vmem:[%s3874_s1 + $0x3a8] ss:$16 sps:$4 sm:$0xff]  }
  0x3f   : > { %1237 = vmatpush1.bf16.msra.mxu0 %v2804_v59  ;;  %1323 = vmatpush1.bf16.msra.mxu1 %v2805_v60  ;;  %v2901_v59 = vld [vmem:[%s3874_s1 + $0x3c4] ss:$16 sps:$4 sm:$0xff]   ;;  %v2904_v60 = vld [vmem:[%s3874_s1 + $0x3cc] ss:$16 sps:$4 sm:$0xff]  }
  0x40   : > { %1238 = vmatprep.subr.bf16.mxu0 %v2806_v61  ;;  %1324 = vmatprep.subr.bf16.mxu1 %v2808_v62  ;;  %v2899_v61 = vld [vmem:[%s3874_s1 + $0x3c0] ss:$16 sps:$4 sm:$0xff]   ;;  %v2902_v62 = vld [vmem:[%s3874_s1 + $0x3c8] ss:$16 sps:$4 sm:$0xff]  }
  0x43   : > { %1239 = vmatpush1.bf16.msra.mxu0 %v2810_v63  ;;  %1325 = vmatpush1.bf16.msra.mxu1 %v2811_v0  ;;  %v2907_v63 = vld [vmem:[%s3874_s1 + $0x3e4] ss:$16 sps:$4 sm:$0xff]   ;;  %v2910_v0 = vld [vmem:[%s3874_s1 + $0x3ec] ss:$16 sps:$4 sm:$0xff]  }
  0x44   : > { %1251 = vmatprep.subr.bf16.mxu0 %v2817_v1  ;;  %1337 = vmatprep.subr.bf16.mxu1 %v2820_v2  ;;  %v2905_v1 = vld [vmem:[%s3874_s1 + $0x3e0] ss:$16 sps:$4 sm:$0xff]   ;;  %v2908_v2 = vld [vmem:[%s3874_s1 + $0x3e8] ss:$16 sps:$4 sm:$0xff]  }
  0x46   : > { %1241 = vmatmul.mubr.bf16.vlgmr.msra.gmra.mrb[0].mxu0 %v2812_v3  ;;  %1327 = vmatmul.mubr.bf16.vlgmr.msra.gmra.mrb[0].mxu1 %v2812_v3  ;;  %v2916_v3 = vld [vmem:[%s3876_s3 + $0x4] ss:$8 sps:$4 sm:$0xff]  }
  0x47   : > { %1252 = vmatpush1.bf16.msra.mxu0 %v2815_v4  ;;  %1338 = vmatpush1.bf16.msra.mxu1 %v2818_v5  ;;  %v2911_v4 = vld [vmem:[%s3271_s27 + $0x8] ss:$16 sps:$4 sm:$0xff]  }
  0x48   : > { %1253 = vmatprep.subr.bf16.mxu0 %v2823_v6  ;;  %1339 = vmatprep.subr.bf16.mxu1 %v2826_v7  ;;  %v2914_v5 = vld [vmem:[%s3876_s3] ss:$8 sps:$4 sm:$0xff]   ;;  %v2919_v6 = vld [vmem:[%s3876_s3 + $0x14] ss:$8 sps:$4 sm:$0xff]   ;;  %v2917_v7 = vld [vmem:[%s3876_s3 + $0x10] ss:$8 sps:$4 sm:$0xff]  }
  0x49   : > { %1283 = vmatprep.mubr.bf16.mxu0 %v2913_v30  ;;  %1369 = vmatprep.mubr.bf16.mxu1 %v2913_v30  ;;  %v2955_v30 = vld [vmem:[%s3876_s3 + $0xd4] ss:$8 sps:$4 sm:$0xff]  }
  0x4b   : > { %1254 = vmatpush1.bf16.msra.mxu0 %v2821_v8  ;;  %1340 = vmatpush1.bf16.msra.mxu1 %v2824_v9  ;;  %v2922_v8 = vld [vmem:[%s3876_s3 + $0x24] ss:$8 sps:$4 sm:$0xff]   ;;  %v2920_v9 = vld [vmem:[%s3876_s3 + $0x20] ss:$8 sps:$4 sm:$0xff]  }
  0x4c   : > { %1255 = vmatprep.subr.bf16.mxu0 %v2829_v10  ;;  %1341 = vmatprep.subr.bf16.mxu1 %v2832_v11  ;;  %v2925_v10 = vld [vmem:[%s3876_s3 + $0x34] ss:$8 sps:$4 sm:$0xff]   ;;  %v2923_v11 = vld [vmem:[%s3876_s3 + $0x30] ss:$8 sps:$4 sm:$0xff]  }
  0x4f   : > { %1256 = vmatpush1.bf16.msra.mxu0 %v2827_v12  ;;  %1342 = vmatpush1.bf16.msra.mxu1 %v2830_v13  ;;  %v2928_v12 = vld [vmem:[%s3876_s3 + $0x44] ss:$8 sps:$4 sm:$0xff]   ;;  %v2926_v13 = vld [vmem:[%s3876_s3 + $0x40] ss:$8 sps:$4 sm:$0xff]  }
  0x50   : > { %1257 = vmatprep.subr.bf16.mxu0 %v2835_v14  ;;  %1343 = vmatprep.subr.bf16.mxu1 %v2838_v15  ;;  %v2931_v14 = vld [vmem:[%s3876_s3 + $0x54] ss:$8 sps:$4 sm:$0xff]   ;;  %v2929_v15 = vld [vmem:[%s3876_s3 + $0x50] ss:$8 sps:$4 sm:$0xff]  }
  0x53   : > { %1258 = vmatpush1.bf16.msra.mxu0 %v2833_v16  ;;  %1344 = vmatpush1.bf16.msra.mxu1 %v2836_v17  ;;  %v2934_v16 = vld [vmem:[%s3876_s3 + $0x64] ss:$8 sps:$4 sm:$0xff]   ;;  %v2932_v17 = vld [vmem:[%s3876_s3 + $0x60] ss:$8 sps:$4 sm:$0xff]  }
  0x54   : > { %1259 = vmatprep.subr.bf16.mxu0 %v2841_v18  ;;  %1345 = vmatprep.subr.bf16.mxu1 %v2844_v19  ;;  %v2937_v18 = vld [vmem:[%s3876_s3 + $0x74] ss:$8 sps:$4 sm:$0xff]   ;;  %v2935_v19 = vld [vmem:[%s3876_s3 + $0x70] ss:$8 sps:$4 sm:$0xff]  }
  0x57   : > { %1260 = vmatpush1.bf16.msra.mxu0 %v2839_v20  ;;  %1346 = vmatpush1.bf16.msra.mxu1 %v2842_v21  ;;  %v2940_v20 = vld [vmem:[%s3876_s3 + $0x84] ss:$8 sps:$4 sm:$0xff]   ;;  %v2938_v21 = vld [vmem:[%s3876_s3 + $0x80] ss:$8 sps:$4 sm:$0xff]  }
  0x58   : > { %1261 = vmatprep.subr.bf16.mxu0 %v2847_v22  ;;  %1347 = vmatprep.subr.bf16.mxu1 %v2850_v23  ;;  %v2943_v22 = vld [vmem:[%s3876_s3 + $0x94] ss:$8 sps:$4 sm:$0xff]   ;;  %v2941_v23 = vld [vmem:[%s3876_s3 + $0x90] ss:$8 sps:$4 sm:$0xff]  }
  0x5b   : > { %1262 = vmatpush1.bf16.msra.mxu0 %v2845_v24  ;;  %1348 = vmatpush1.bf16.msra.mxu1 %v2848_v25  ;;  %v2946_v24 = vld [vmem:[%s3876_s3 + $0xa4] ss:$8 sps:$4 sm:$0xff]   ;;  %v2944_v25 = vld [vmem:[%s3876_s3 + $0xa0] ss:$8 sps:$4 sm:$0xff]  }
  0x5c   : > { %1263 = vmatprep.subr.bf16.mxu0 %v2853_v26  ;;  %1349 = vmatprep.subr.bf16.mxu1 %v2856_v27  ;;  %v2949_v26 = vld [vmem:[%s3876_s3 + $0xb4] ss:$8 sps:$4 sm:$0xff]   ;;  %v2947_v27 = vld [vmem:[%s3876_s3 + $0xb0] ss:$8 sps:$4 sm:$0xff]  }
  0x5f   : > { %1264 = vmatpush1.bf16.msra.mxu0 %v2851_v28  ;;  %1350 = vmatpush1.bf16.msra.mxu1 %v2854_v29  ;;  %v2952_v28 = vld [vmem:[%s3876_s3 + $0xc4] ss:$8 sps:$4 sm:$0xff]   ;;  %v2950_v29 = vld [vmem:[%s3876_s3 + $0xc0] ss:$8 sps:$4 sm:$0xff]  }
  0x60   : > { %1265 = vmatprep.subr.bf16.mxu0 %v2859_v31  ;;  %1351 = vmatprep.subr.bf16.mxu1 %v2862_v32  ;;  %v2953_v31 = vld [vmem:[%s3876_s3 + $0xd0] ss:$8 sps:$4 sm:$0xff]   ;;  %v2958_v32 = vld [vmem:[%s3876_s3 + $0xe4] ss:$8 sps:$4 sm:$0xff]  }
  0x63   : > { %1266 = vmatpush1.bf16.msra.mxu0 %v2857_v33  ;;  %1352 = vmatpush1.bf16.msra.mxu1 %v2860_v34  ;;  %v2956_v33 = vld [vmem:[%s3876_s3 + $0xe0] ss:$8 sps:$4 sm:$0xff]   ;;  %v2961_v34 = vld [vmem:[%s3876_s3 + $0xf4] ss:$8 sps:$4 sm:$0xff]  }
  0x64   : > { %1267 = vmatprep.subr.bf16.mxu0 %v2865_v35  ;;  %1353 = vmatprep.subr.bf16.mxu1 %v2868_v36  ;;  %v2959_v35 = vld [vmem:[%s3876_s3 + $0xf0] ss:$8 sps:$4 sm:$0xff]   ;;  %v2964_v36 = vld [vmem:[%s3876_s3 + $0x104] ss:$8 sps:$4 sm:$0xff]  }
  0x67   : > { %1268 = vmatpush1.bf16.msra.mxu0 %v2863_v37  ;;  %1354 = vmatpush1.bf16.msra.mxu1 %v2866_v38  ;;  %v3010_v37 = vld [vmem:[%s3878_s5 + $0x40] sm:$0xff]  }
  0x68   : > { %1269 = vmatprep.subr.bf16.mxu0 %v2871_v39  ;;  %1355 = vmatprep.subr.bf16.mxu1 %v2874_v40  ;;  %v3011_v38 = vld [vmem:[%s3878_s5] sm:$0xff]   ;;  %v3012_v39 = vld [vmem:[%s3878_s5 + $0x48] sm:$0xff]  }
  0x69   : > { %v3013_v40 = vld [vmem:[%s3878_s5 + $0x8] sm:$0xff]  }
  0x6b   : > { %1270 = vmatpush1.bf16.msra.mxu0 %v2869_v41  ;;  %1356 = vmatpush1.bf16.msra.mxu1 %v2872_v42  ;;  %v3014_v41 = vld [vmem:[%s3878_s5 + $0x50] sm:$0xff]  }
  0x6c   : > { %1271 = vmatprep.subr.bf16.mxu0 %v2877_v43  ;;  %1357 = vmatprep.subr.bf16.mxu1 %v2880_v44  ;;  %v3015_v42 = vld [vmem:[%s3878_s5 + $0x10] sm:$0xff]   ;;  %v3016_v43 = vld [vmem:[%s3878_s5 + $0x58] sm:$0xff]  }
  0x6d   : > { %v3017_v44 = vld [vmem:[%s3878_s5 + $0x18] sm:$0xff]  }
  0x6f   : > { %1272 = vmatpush1.bf16.msra.mxu0 %v2875_v45  ;;  %1358 = vmatpush1.bf16.msra.mxu1 %v2878_v46  ;;  %v3018_v45 = vld [vmem:[%s3878_s5 + $0x60] sm:$0xff]  }
  0x70   : > { %1273 = vmatprep.subr.bf16.mxu0 %v2883_v47  ;;  %1359 = vmatprep.subr.bf16.mxu1 %v2886_v48  ;;  %v3019_v46 = vld [vmem:[%s3878_s5 + $0x20] sm:$0xff]   ;;  %v3020_v47 = vld [vmem:[%s3878_s5 + $0x68] sm:$0xff]   ;;  %v528_v48 = vlaneseq }
  0x73   : > { %1274 = vmatpush1.bf16.msra.mxu0 %v2881_v49  ;;  %1360 = vmatpush1.bf16.msra.mxu1 %v2884_v50  ;;  %v3658_v49 = vshrl.u32 %v528_v48, 7  ;;  %v3003_v48 = vld [vmem:[%s3876_s3 + $0x1d4] ss:$8 sps:$4 sm:$0xff]  }
  0x74   : > { %1275 = vmatprep.subr.bf16.mxu0 %v2889_v51  ;;  %1361 = vmatprep.subr.bf16.mxu1 %v2892_v52  ;;  %v526_v52 = vld [vmem:[%s3875_s2] sm:$0xf] }
  0x75   : > { %v530_v50 = vsub.s32 0, %v3658_v49  ;;  %v538_v51 = vsub.s32 2, %v3658_v49 }
  0x77   : > { %1276 = vmatpush1.bf16.msra.mxu0 %v2887_v53  ;;  %1362 = vmatpush1.bf16.msra.mxu1 %v2890_v54  ;;  %v534_v53 = vsub.s32 1, %v3658_v49  ;;  %v542_v54 = vsub.s32 3, %v3658_v49  ;;  %v3027_v49 = vld [vmem:[%s3880_s7 + $0x8] sm:$0xff]  }
  0x78   : > { %1277 = vmatprep.subr.bf16.mxu0 %v2895_v55  ;;  %1363 = vmatprep.subr.bf16.mxu1 %v2898_v56  ;;  %v531_v55 = vrot.slane %v526_v52, %v530_v50  ;;  %v539_v56 = vrot.slane %v526_v52, %v538_v51  ;;  %v3001_v51 = vld [vmem:[%s3876_s3 + $0x1d0] ss:$8 sps:$4 sm:$0xff]  }
  0x7b   : > { %1278 = vmatpush1.bf16.msra.mxu0 %v2893_v57  ;;  %1364 = vmatpush1.bf16.msra.mxu1 %v2896_v58  ;;  %v535_v57 = vrot.slane %v526_v52, %v534_v53  ;;  %v543_v58 = vrot.slane %v526_v52, %v542_v54  ;;  %v3006_v52 = vld [vmem:[%s3876_s3 + $0x1e4] ss:$8 sps:$4 sm:$0xff]   ;;  %v3004_v54 = vld [vmem:[%s3876_s3 + $0x1e0] ss:$8 sps:$4 sm:$0xff]  }
  0x7c   : > { %1279 = vmatprep.subr.bf16.mxu0 %v2901_v59  ;;  %1365 = vmatprep.subr.bf16.mxu1 %v2904_v60 }
  0x7f   : > { %1280 = vmatpush1.bf16.msra.mxu0 %v2899_v61  ;;  %1366 = vmatpush1.bf16.msra.mxu1 %v2902_v62 }
  0x80   : > { %1281 = vmatprep.subr.bf16.mxu0 %v2907_v63  ;;  %1367 = vmatprep.subr.bf16.mxu1 %v2910_v0 }
  0x83   : > { %1282 = vmatpush1.bf16.msra.mxu0 %v2905_v1  ;;  %1368 = vmatpush1.bf16.msra.mxu1 %v2908_v2 }
  0x84   : > { %1788 = vmatprep.subr.bf16.mxu0 %v2916_v3  ;;  %2602 = vmatprep.subr.bf16.mxu1 %v3010_v37  ;;  %v2983_v37 = vld [vmem:[%s3876_s3 + $0x170] ss:$8 sps:$4 sm:$0xff]  }
  0x86   : > { %1284 = vmatmul.mubr.bf16.vlgmr.msra.gmra.mrb[0].mxu0 %v2911_v4  ;;  %1370 = vmatmul.mubr.bf16.vlgmr.msra.gmra.mrb[0].mxu1 %v2911_v4 }
  0x87   : > { %1789 = vmatpush1.bf16.msra.mxu0 %v2914_v5  ;;  %2603 = vmatpush3.bf16.msra.mxu1 %v3011_v38  ;;  %v2988_v38 = vld [vmem:[%s3876_s3 + $0x184] ss:$8 sps:$4 sm:$0xff]  }
  0x88   : > { %1790 = vmatprep.subr.bf16.mxu0 %v2919_v6  ;;  %2604 = vmatprep.subr.bf16.mxu1 %v3012_v39  ;;  %v2986_v39 = vld [vmem:[%s3876_s3 + $0x180] ss:$8 sps:$4 sm:$0xff]  }
  0x8b   : > { %1791 = vmatpush1.bf16.msra.mxu0 %v2917_v7  ;;  %2605 = vmatpush3.bf16.msra.mxu1 %v3013_v40  ;;  %v2991_v40 = vld [vmem:[%s3876_s3 + $0x194] ss:$8 sps:$4 sm:$0xff]  }
  0x8c   : > { %1792 = vmatprep.subr.bf16.mxu0 %v2922_v8  ;;  %2606 = vmatprep.subr.bf16.mxu1 %v3014_v41  ;;  %v2989_v41 = vld [vmem:[%s3876_s3 + $0x190] ss:$8 sps:$4 sm:$0xff]  }
  0x8f   : > { %1793 = vmatpush1.bf16.msra.mxu0 %v2920_v9  ;;  %2607 = vmatpush3.bf16.msra.mxu1 %v3015_v42  ;;  %v2994_v42 = vld [vmem:[%s3876_s3 + $0x1a4] ss:$8 sps:$4 sm:$0xff]  }
  0x90   : > { %1794 = vmatprep.subr.bf16.mxu0 %v2925_v10  ;;  %2608 = vmatprep.subr.bf16.mxu1 %v3016_v43  ;;  %v2992_v43 = vld [vmem:[%s3876_s3 + $0x1a0] ss:$8 sps:$4 sm:$0xff]  }
  0x93   : > { %1795 = vmatpush1.bf16.msra.mxu0 %v2923_v11  ;;  %2609 = vmatpush3.bf16.msra.mxu1 %v3017_v44  ;;  %v2997_v44 = vld [vmem:[%s3876_s3 + $0x1b4] ss:$8 sps:$4 sm:$0xff]  }
  0x94   : > { %1796 = vmatprep.subr.bf16.mxu0 %v2928_v12  ;;  %2610 = vmatprep.subr.bf16.mxu1 %v3018_v45  ;;  %v2995_v45 = vld [vmem:[%s3876_s3 + $0x1b0] ss:$8 sps:$4 sm:$0xff]  }
  0x97   : > { %1797 = vmatpush1.bf16.msra.mxu0 %v2926_v13  ;;  %2611 = vmatpush3.bf16.msra.mxu1 %v3019_v46  ;;  %v3000_v46 = vld [vmem:[%s3876_s3 + $0x1c4] ss:$8 sps:$4 sm:$0xff]  }
  0x98   : > { %1798 = vmatprep.subr.bf16.mxu0 %v2931_v14  ;;  %2612 = vmatprep.subr.bf16.mxu1 %v3020_v47  ;;  %v2998_v47 = vld [vmem:[%s3876_s3 + $0x1c0] ss:$8 sps:$4 sm:$0xff]  }
  0x9b   : > { %1799 = vmatpush1.bf16.msra.mxu0 %v2929_v15 }
  0x9c   : > { %1800 = vmatprep.subr.bf16.mxu0 %v2934_v16 }
  0x9f   : > { %1801 = vmatpush1.bf16.msra.mxu0 %v2932_v17 }
  0xa0   : > { %1802 = vmatprep.subr.bf16.mxu0 %v2937_v18 }
  0xa3   : > { %1803 = vmatpush1.bf16.msra.mxu0 %v2935_v19 }
  0xa4   : > { %1804 = vmatprep.subr.bf16.mxu0 %v2940_v20 }
  0xa7   : > { %1805 = vmatpush1.bf16.msra.mxu0 %v2938_v21 }
  0xa8   : > { %1806 = vmatprep.subr.bf16.mxu0 %v2943_v22 }
  0xab   : > { %1807 = vmatpush1.bf16.msra.mxu0 %v2941_v23  ;;  %v2962_v23 = vld [vmem:[%s3876_s3 + $0x100] ss:$8 sps:$4 sm:$0xff]  }
  0xac   : > { %1808 = vmatprep.subr.bf16.mxu0 %v2946_v24  ;;  %v2967_v24 = vld [vmem:[%s3876_s3 + $0x114] ss:$8 sps:$4 sm:$0xff]  }
  0xaf   : > { %1809 = vmatpush1.bf16.msra.mxu0 %v2944_v25  ;;  %v2965_v25 = vld [vmem:[%s3876_s3 + $0x110] ss:$8 sps:$4 sm:$0xff]  }
  0xb0   : > { %1810 = vmatprep.subr.bf16.mxu0 %v2949_v26  ;;  %v2970_v26 = vld [vmem:[%s3876_s3 + $0x124] ss:$8 sps:$4 sm:$0xff]  }
  0xb3   : > { %1811 = vmatpush1.bf16.msra.mxu0 %v2947_v27  ;;  %v2968_v27 = vld [vmem:[%s3876_s3 + $0x120] ss:$8 sps:$4 sm:$0xff]  }
  0xb4   : > { %1812 = vmatprep.subr.bf16.mxu0 %v2952_v28  ;;  %v2973_v28 = vld [vmem:[%s3876_s3 + $0x134] ss:$8 sps:$4 sm:$0xff]  }
  0xb7   : > { %1813 = vmatpush1.bf16.msra.mxu0 %v2950_v29  ;;  %v2971_v29 = vld [vmem:[%s3876_s3 + $0x130] ss:$8 sps:$4 sm:$0xff]  }
  0xb8   : > { %1814 = vmatprep.subr.bf16.mxu0 %v2955_v30  ;;  %v2976_v30 = vld [vmem:[%s3876_s3 + $0x144] ss:$8 sps:$4 sm:$0xff]  }
  0xbb   : > { %1815 = vmatpush1.bf16.msra.mxu0 %v2953_v31  ;;  %v2974_v31 = vld [vmem:[%s3876_s3 + $0x140] ss:$8 sps:$4 sm:$0xff]  }
  0xbc   : > { %1816 = vmatprep.subr.bf16.mxu0 %v2958_v32  ;;  %v2979_v32 = vld [vmem:[%s3876_s3 + $0x154] ss:$8 sps:$4 sm:$0xff]  }
  0xbf   : > { %1817 = vmatpush1.bf16.msra.mxu0 %v2956_v33  ;;  %v2977_v33 = vld [vmem:[%s3876_s3 + $0x150] ss:$8 sps:$4 sm:$0xff]  }
  0xc0   : > { %1818 = vmatprep.subr.bf16.mxu0 %v2961_v34  ;;  %v2982_v34 = vld [vmem:[%s3876_s3 + $0x164] ss:$8 sps:$4 sm:$0xff]  }
  0xc3   : > { %1819 = vmatpush1.bf16.msra.mxu0 %v2959_v35  ;;  %v2980_v35 = vld [vmem:[%s3876_s3 + $0x160] ss:$8 sps:$4 sm:$0xff]  }
  0xc4   : > { %1831 = vmatprep.subr.bf16.mxu0 %v2964_v36  ;;  %v2985_v36 = vld [vmem:[%s3876_s3 + $0x174] ss:$8 sps:$4 sm:$0xff]  }
 0x159   : > { %v1285_v59 = vpop.f32.mrb[0].mxu0  ;;  %v1371_v60 = vpop.f32.mrb[0].mxu1 }
 0x15a   : > { %v2682_v61 = vadd.f32 %v1285_v59, %v531_v55  ;;  %v2686_v62 = vadd.f32 %v1371_v60, %v539_v56  ;;  %v1287_v63 = vpop.f32.mrb[1].mxu0  ;;  %v1373_v0 = vpop.f32.mrb[1].mxu1  ;;  %v3023_v59 = vld [vmem:[%s3878_s5 + $0x30] sm:$0xff]   ;;  %v3024_v60 = vld [vmem:[%s3878_s5 + $0x78] sm:$0xff]  }
 0x15b   : > { %v2683_v1 = vadd.f32 %v1287_v63, %v535_v57  ;;  %v2687_v2 = vadd.f32 %v1373_v0, %v543_v58  ;;  %v1289_v3 = vpop.f32.mrb[2].mxu0  ;;  %v1375_v4 = vpop.f32.mrb[2].mxu1  ;;  %v1456_v63 = vld [vmem:[%s3877_s4] sm:$0x3] }
 0x15c   : > { %v2684_v5 = vadd.f32 %v1289_v3, %v531_v55  ;;  %v2688_v6 = vadd.f32 %v1375_v4, %v539_v56  ;;  %v1291_v7 = vpop.f32.mrb[3].mxu0  ;;  %v1377_v8 = vpop.f32.mrb[3].mxu1  ;;  %v1380_v11 = vmax.f32 %v2682_v61, 0.0  ;;  %v1382_v12 = vmax.f32 %v2686_v62, 0.0  ;;  %v3009_v55 = vld [vmem:[%s3876_s3 + $0x1f4] ss:$8 sps:$4 sm:$0xff]  }
 0x15d   : > { %v2685_v9 = vadd.f32 %v1291_v7, %v535_v57  ;;  %v2689_v10 = vadd.f32 %v1377_v8, %v543_v58  ;;  %v1381_v15 = vmax.f32 %v2683_v1, 0.0  ;;  %v1383_v16 = vmax.f32 %v2687_v2, 0.0  ;;  %v3007_v56 = vld [vmem:[%s3876_s3 + $0x1f0] ss:$8 sps:$4 sm:$0xff]   ;;  %v3021_v57 = vld [vmem:[%s3878_s5 + $0x28] sm:$0xff]  }
 0x15e   : > { %v1384_v13 = vmax.f32 %v2684_v5, 0.0  ;;  %v1386_v14 = vmax.f32 %v2688_v6, 0.0  ;;  %2613 = vmatpush3.bf16.msra.mxu1 %v3021_v57  ;;  %v3022_v58 = vld [vmem:[%s3878_s5 + $0x70] sm:$0xff]   ;;  %v3025_v61 = vld [vmem:[%s3878_s5 + $0x38] sm:$0xff]   ;;  %v3058_v62 = vmov 0.0   ;;  %v1461_v0 = vrot.slane %v1456_v63, %v530_v50  ;;  %v3026_v50 = vld [vmem:[%s3880_s7] sm:$0xff]  }
 0x15f   : > { %v1385_v17 = vmax.f32 %v2685_v9, 0.0  ;;  %v1387_v18 = vmax.f32 %v2689_v10, 0.0  ;;  %2614 = vmatprep.subr.bf16.mxu1 %v3022_v58  ;;  %v1465_v1 = vrot.slane %v1456_v63, %v534_v53  ;;  %v3028_v53 = vld [vmem:[%s3880_s7 + $0x10] sm:$0xff]  }
 0x160   : > { %v1388_v19 = vpack.c.bf16 %v1384_v13, %v1380_v11  ;;  %v3671_v20 = vpack.c.bf16 %v1386_v14, %v1382_v12 }
 0x161   : > { %v1389_v21 = vpack.c.bf16 %v1385_v17, %v1381_v15  ;;  %v1391_v22 = vpack.c.bf16 %v1387_v18, %v1383_v16  ;;  %v3029_v16 = vld [vmem:[%s3880_s7 + $0x18] sm:$0xff]   ;;  %v3030_v17 = vld [vmem:[%s3880_s7 + $0x20] sm:$0xff]   ;;  %v3031_v18 = vld [vmem:[%s3880_s7 + $0x28] sm:$0xff]  }
 0x162   : > { %2615 = vmatpush3.bf16.msra.mxu1 %v3023_v59 }
 0x163   : > { %1820 = vmatprep.mubr.bf16.mxu0 %v1389_v21  ;;  %2616 = vmatprep.subr.bf16.mxu1 %v3024_v60 }
 0x164   : > { %1821 = vmatmul.mubr.bf16.vlgmr.msra.gmra.mrb[4].mxu0 %v1388_v19  ;;  %v3032_v19 = vld [vmem:[%s3880_s7 + $0x30] sm:$0xff]  }
 0x165   : > { %1832 = vmatpush1.bf16.msra.mxu0 %v2962_v23  ;;  %1863 = vmatprep.mubr.bf16.mxu0 %v1391_v22  ;;  %v2562_v22 = vld [vmem:[%s3879_s6] ss:$0 sm:$0xff] }
 0x166   : > { %1833 = vmatprep.subr.bf16.mxu0 %v2967_v24  ;;  %2617 = vmatpush3.bf16.msra.mxu1 %v3025_v61 }
 0x167   : > { %2642 = vmatprep.subr.bf16.mxu1 %v3058_v62 }
 0x169   : > { %1834 = vmatpush1.bf16.msra.mxu0 %v2965_v25 }
 0x16a   : > { %1835 = vmatprep.subr.bf16.mxu0 %v2970_v26 }
 0x16d   : > { %1836 = vmatpush1.bf16.msra.mxu0 %v2968_v27 }
 0x16e   : > { %1837 = vmatprep.subr.bf16.mxu0 %v2973_v28 }
 0x171   : > { %1838 = vmatpush1.bf16.msra.mxu0 %v2971_v29 }
 0x172   : > { %1839 = vmatprep.subr.bf16.mxu0 %v2976_v30 }
 0x175   : > { %1840 = vmatpush1.bf16.msra.mxu0 %v2974_v31 }
 0x176   : > { %1841 = vmatprep.subr.bf16.mxu0 %v2979_v32  ;;  %v3034_v32 = vld [vmem:[%s3882_s9] sm:$0xff]  }
 0x179   : > { %1842 = vmatpush1.bf16.msra.mxu0 %v2977_v33 }
 0x17a   : > { %1843 = vmatprep.subr.bf16.mxu0 %v2982_v34  ;;  %v3035_v34 = vld [vmem:[%s3882_s9 + $0x8] sm:$0xff]  }
 0x17d   : > { %1844 = vmatpush1.bf16.msra.mxu0 %v2980_v35  ;;  %v3036_v35 = vld [vmem:[%s3882_s9 + $0x10] sm:$0xff]  }
 0x17e   : > { %1845 = vmatprep.subr.bf16.mxu0 %v2985_v36  ;;  %v3037_v36 = vld [vmem:[%s3882_s9 + $0x18] sm:$0xff]  }
 0x181   : > { %1846 = vmatpush1.bf16.msra.mxu0 %v2983_v37  ;;  %v3038_v37 = vld [vmem:[%s3882_s9 + $0x20] sm:$0xff]  }
 0x182   : > { %1847 = vmatprep.subr.bf16.mxu0 %v2988_v38  ;;  %v3039_v38 = vld [vmem:[%s3882_s9 + $0x28] sm:$0xff]  }
 0x185   : > { %1848 = vmatpush1.bf16.msra.mxu0 %v2986_v39  ;;  %v3040_v39 = vld [vmem:[%s3882_s9 + $0x30] sm:$0xff]  }
 0x186   : > { %1849 = vmatprep.subr.bf16.mxu0 %v2991_v40  ;;  %v3041_v40 = vld [vmem:[%s3882_s9 + $0x38] sm:$0xff]  }
 0x189   : > { %1850 = vmatpush1.bf16.msra.mxu0 %v2989_v41  ;;  %v2579_v41 = vld [vmem:[%s3881_s8] ss:$0 sm:$0xff] }
 0x18a   : > { %1851 = vmatprep.subr.bf16.mxu0 %v2994_v42 }
 0x18d   : > { %1852 = vmatpush1.bf16.msra.mxu0 %v2992_v43 }
 0x18e   : > { %1853 = vmatprep.subr.bf16.mxu0 %v2997_v44 }
 0x191   : > { %1854 = vmatpush1.bf16.msra.mxu0 %v2995_v45 }
 0x192   : > { %1855 = vmatprep.subr.bf16.mxu0 %v3000_v46 }
 0x195   : > { %1856 = vmatpush1.bf16.msra.mxu0 %v2998_v47 }
 0x196   : > { %1857 = vmatprep.subr.bf16.mxu0 %v3003_v48 }
 0x199   : > { %1858 = vmatpush1.bf16.msra.mxu0 %v3001_v51 }
 0x19a   : > { %1859 = vmatprep.subr.bf16.mxu0 %v3006_v52 }
 0x19d   : > { %1860 = vmatpush1.bf16.msra.mxu0 %v3004_v54  ;;  %v2588_v54 = vld [vmem:[%s3883_s10] ss:$0 sm:$0xff] }
 0x19e   : > { %1861 = vmatprep.subr.bf16.mxu0 %v3009_v55 }
 0x1a1   : > { %1862 = vmatpush1.bf16.msra.mxu0 %v3007_v56 }
 0x1a4   : > { %1864 = vmatmul.mubr.bf16.vlgmr.msra.gmra.mrb[4].mxu0 %v3671_v20  ;;  %v3033_v20 = vld [vmem:[%s3880_s7 + $0x38] sm:$0xff]  }
 0x277   : > { %v1865_v2 = vpop.f32.mrb[4].mxu0 }
 0x278   : > { %v2690_v3 = vadd.f32 %v1865_v2, %v1461_v0  ;;  %v1867_v4 = vpop.f32.mrb[5].mxu0 }
 0x279   : > { %v2691_v5 = vadd.f32 %v1867_v4, %v1465_v1  ;;  %v1869_v6 = vpop.f32.mrb[6].mxu0 }
 0x27a   : > { %v2692_v7 = vadd.f32 %v1869_v6, %v1461_v0  ;;  %v1871_v8 = vpop.f32.mrb[7].mxu0  ;;  %v1874_v10 = vmax.f32 %v2690_v3, 0.0 }
 0x27b   : > { %v2693_v9 = vadd.f32 %v1871_v8, %v1465_v1  ;;  %v1875_v12 = vmax.f32 %v2691_v5, 0.0 }
 0x27c   : > { %v1876_v11 = vmax.f32 %v2692_v7, 0.0 }
 0x27d   : > { %v1877_v13 = vmax.f32 %v2693_v9, 0.0 }
 0x27e   : > { %v1878_v14 = vpack.c.bf16 %v1876_v11, %v1874_v10 }
 0x27f   : > { %v1879_v15 = vpack.c.bf16 %v1877_v13, %v1875_v12 }
 0x281   : > { %2047 = vmatprep.mubr.bf16.mxu1 %v1879_v15 }
 0x282   : > { %2048 = vmatmul.mubr.bf16.vlgmr.msra.gmra.mrb[4].mxu1 %v1878_v14 }
 0x283   : > { %2643 = vmatpush3.bf16.msra.mxu1 %v3026_v50  ;;  %2658 = vmatprep.mubr.msk.bf16.mxu1 %vm3059_vm0, %v3058_v62 }
 0x284   : > { %2644 = vmatprep.subr.bf16.mxu1 %v3058_v62 }
 0x287   : > { %2645 = vmatpush3.bf16.msra.mxu1 %v3027_v49 }
 0x288   : > { %2646 = vmatprep.subr.bf16.mxu1 %v3058_v62 }
 0x28b   : > { %2647 = vmatpush3.bf16.msra.mxu1 %v3028_v53 }
 0x28c   : > { %2648 = vmatprep.subr.bf16.mxu1 %v3058_v62 }
 0x28f   : > { %2649 = vmatpush3.bf16.msra.mxu1 %v3029_v16 }
 0x290   : > { %2650 = vmatprep.subr.bf16.mxu1 %v3058_v62 }
 0x293   : > { %2651 = vmatpush3.bf16.msra.mxu1 %v3030_v17 }
 0x294   : > { %2652 = vmatprep.subr.bf16.mxu1 %v3058_v62 }
 0x297   : > { %2653 = vmatpush3.bf16.msra.mxu1 %v3031_v18 }
 0x298   : > { %2654 = vmatprep.subr.bf16.mxu1 %v3058_v62 }
 0x29b   : > { %2655 = vmatpush3.bf16.msra.mxu1 %v3032_v19 }
 0x29c   : > { %2656 = vmatprep.subr.bf16.mxu1 %v3058_v62 }
 0x29f   : > { %2657 = vmatpush3.bf16.msra.mxu1 %v3033_v20 }
 0x2a0   : > { %2662 = vmatprep.subr.bf16.mxu1 %v3058_v62 }
 0x355   : > { %v2618_v21 = vpop.f32.mrb[4].mxu1 }
 0x356   : > { %v2619_v23 = vpop.f32.mrb[5].mxu1 }
 0x357   : > { %v2620_v24 = vadd.f32 %v2619_v23, %v2618_v21  ;;  %v2621_v25 = vpop.f32.mrb[6].mxu1 }
 0x358   : > { %v2622_v26 = vpop.f32.mrb[7].mxu1 }
 0x359   : > { %v2050_v27 = vadd.f32 %v2620_v24, %v2562_v22  ;;  %v2623_v28 = vadd.f32 %v2622_v26, %v2621_v25 }
 0x35b   : > { %v2053_v29 = vadd.f32 %v2623_v28, %v2562_v22  ;;  %v2056_v30 = vmax.f32 %v2050_v27, 0.0 }
 0x35d   : > { %v2057_v31 = vmax.f32 %v2053_v29, 0.0 }
 0x35f   : > { %v2058_v33 = vpack.c.bf16 %v2057_v31, %v2056_v30 }
 0x361   : > { %2659 = vmatmul.mubr.bf16.vlgmr.msra.gmra.mrb[8].mxu1 %v2058_v33 }
 0x362   : > { %2663 = vmatpush3.bf16.msra.mxu1 %v3034_v32  ;;  %2678 = vmatprep.mubr.msk.bf16.mxu1 %vm3059_vm0, %v3058_v62 }
 0x363   : > { %2664 = vmatprep.subr.bf16.mxu1 %v3058_v62 }
 0x366   : > { %2665 = vmatpush3.bf16.msra.mxu1 %v3035_v34 }
 0x367   : > { %2666 = vmatprep.subr.bf16.mxu1 %v3058_v62 }
 0x36a   : > { %2667 = vmatpush3.bf16.msra.mxu1 %v3036_v35 }
 0x36b   : > { %2668 = vmatprep.subr.bf16.mxu1 %v3058_v62 }
 0x36e   : > { %2669 = vmatpush3.bf16.msra.mxu1 %v3037_v36 }
 0x36f   : > { %2670 = vmatprep.subr.bf16.mxu1 %v3058_v62 }
 0x372   : > { %2671 = vmatpush3.bf16.msra.mxu1 %v3038_v37 }
 0x373   : > { %2672 = vmatprep.subr.bf16.mxu1 %v3058_v62 }
 0x376   : > { %2673 = vmatpush3.bf16.msra.mxu1 %v3039_v38 }
 0x377   : > { %2674 = vmatprep.subr.bf16.mxu1 %v3058_v62 }
 0x37a   : > { %2675 = vmatpush3.bf16.msra.mxu1 %v3040_v39 }
 0x37b   : > { %2676 = vmatprep.subr.bf16.mxu1 %v3058_v62 }
 0x37e   : > { %2677 = vmatpush3.bf16.msra.mxu1 %v3041_v40 }
 0x434   : > { %v2164_v42 = vpop.f32.mrb[8].mxu1 }
 0x435   : > { %v2165_v43 = vadd.f32 %v2579_v41, %v2164_v42  ;;  %v2660_v44 = vpop.f32.mrb[9].mxu1 }
 0x436   : > { %v2167_v45 = vpop.f32.mrb[10].mxu1 }
 0x437   : > { %v2168_v46 = vadd.f32 %v2579_v41, %v2167_v45  ;;  %v2661_v47 = vpop.f32.mrb[11].mxu1  ;;  %v2171_v48 = vmax.f32 %v2165_v43, 0.0 }
 0x439   : > { %v2172_v51 = vmax.f32 %v2168_v46, 0.0 }
 0x43b   : > { %v2173_v52 = vpack.c.bf16 %v2172_v51, %v2171_v48 }
 0x43d   : > { %2679 = vmatmul.mubr.bf16.vlgmr.msra.gmra.mrb[12].mxu1 %v2173_v52 }
 0x510   : > { %v2279_v55 = vpop.f32.mrb[12].mxu1 }
 0x511   : > { %v2280_v56 = vadd.f32 %v2588_v54, %v2279_v55  ;;  %v2680_v57 = vpop.f32.mrb[13].mxu1 }
 0x512   : > { %v2282_v58 = vpop.f32.mrb[14].mxu1 }
 0x513   : > { %v2597_v59 = vmul.f32 -1.442695, %v2280_v56  ;;  %v2283_v60 = vadd.f32 %v2588_v54, %v2282_v58  ;;  %v2681_v61 = vpop.f32.mrb[15].mxu1 }
 0x515   : > { %3042 = vpow2.f32 %v2597_v59  ;;  %v2598_v62 = vmul.f32 -1.442695, %v2283_v60 }
 0x517   : > { %3044 = vpow2.f32 %v2598_v62 }
 0x51f   : > { %v3043_v63 = vpop.eup %3042 }
 0x520   : > { %v2292_v0 = vadd.f32 1.0, %v3043_v63 }
 0x521   : > { %v3045_v1 = vpop.eup %3044 }
 0x522   : > { %3046 = vrcp.f32 %v2292_v0  ;;  %v2293_v2 = vadd.f32 1.0, %v3045_v1 }
 0x524   : > { %3048 = vrcp.f32 %v2293_v2 }
 0x52c   : > { %v3047_v3 = vpop.eup %3046 }
 0x52d   : > { %2298 = vst [vmem:[%s391_s19] sm:$0xff] %v3047_v3 }
 0x52e   : > { %v3049_v4 = vpop.eup %3048 }
 0x52f   : > { %2299 = vst [vmem:[%s391_s19 + $0x8] sm:$0xff] %v3049_v4 }
 0x530 PF: > { %s21_s17 = sadd.s32 1, %s3056_s17  }
 0x531   : > { %p18_p4 = scmp.ge.s32.totalorder %s21_s17, 4  }
 0x533   :  { %20 = sbr.rel (!%p18_p4) target bundleno = 1 (0x1), region = 94 }

</bundles_post_ra>
